<compile_context>
chip_gen: v7x
topology: tpu7x:2x2x1
jax: 0.10.0
libtpu: 0.0.40
codegen_flags: <defaults>
</compile_context>

<pallas_src>
import math

import jax
import jax.numpy as jnp
from jax.experimental import pallas as pl
from jax.experimental.pallas import tpu as pltpu


def _round_up(a, b):
    return ((a + b - 1) // b) * b


def _matmul_kernel(x_ref, wt_ref, o_ref, acc_ref):
    # x_ref:   (tm, tk) tile of the input batch
    # wt_ref:  (tk, tn) tile of the pre-transposed weight (in_features, out_features)
    # o_ref:   (tm, tn) output tile (resident across the K grid axis)
    # acc_ref: (tm, tn) f32 accumulator scratch
    @pl.when(pl.program_id(2) == 0)
    def _init():
        acc_ref[...] = jnp.zeros_like(acc_ref)

    acc_ref[...] += jnp.dot(
        x_ref[...], wt_ref[...], preferred_element_type=jnp.float32
    )

    @pl.when(pl.program_id(2) == pl.num_programs(2) - 1)
    def _store():
        o_ref[...] = acc_ref[...].astype(o_ref.dtype)


def random_projection_forward(x, wt, *, tm=256, tn=256, tk=512, out_dtype=None):
    """y = x @ wt  (== x @ weight.T for nn.Linear weight).

    x:  (batch, in_features)
    wt: (in_features, out_features)  -- weight pre-transposed once at init.
    """
    M, K = x.shape
    K2, N = wt.shape
    assert K == K2, "in_features mismatch"
    if out_dtype is None:
        out_dtype = x.dtype

    # Effective tile sizes: a dimension that fits in one tile uses the full
    # extent (single block, no padding needed); a tiled dimension uses an
    # aligned tile and is zero-padded up to a multiple of it.
    if M <= tm:
        tm_e, M_pad = M, M
    else:
        assert tm % 8 == 0, "tm must be a multiple of 8 when tiling M"
        tm_e, M_pad = tm, _round_up(M, tm)
    if N <= tn:
        tn_e, N_pad = N, N
    else:
        assert tn % 128 == 0, "tn must be a multiple of 128 when tiling N"
        tn_e, N_pad = tn, _round_up(N, tn)
    if K <= tk:
        tk_e, K_pad = K, K
    else:
        assert tk % 128 == 0, "tk must be a multiple of 128 when tiling K"
        tk_e, K_pad = tk, _round_up(K, tk)

    # Zero padding along K adds zero contributions; padded M/N rows/cols are
    # sliced away at the end.
    if (M_pad, K_pad) != (M, K):
        x = jnp.pad(x, ((0, M_pad - M), (0, K_pad - K)))
    if (K_pad, N_pad) != (K, N):
        wt = jnp.pad(wt, ((0, K_pad - K), (0, N_pad - N)))

    grid = (M_pad // tm_e, N_pad // tn_e, K_pad // tk_e)

    # Generation-aware VMEM budget with headroom (double-buffered ins/outs +
    # f32 accumulator), capped at v7x's 64 MiB physical VMEM.
    in_bytes = jnp.dtype(x.dtype).itemsize
    wt_bytes = jnp.dtype(wt.dtype).itemsize
    out_bytes = jnp.dtype(out_dtype).itemsize
    vmem_est = (
        2 * tm_e * tk_e * in_bytes
        + 2 * tk_e * tn_e * wt_bytes
        + 2 * tm_e * tn_e * out_bytes
        + tm_e * tn_e * 4
    )
    vmem_limit = int(min(64 * 2**20, max(2 * vmem_est, 16 * 2**20)))

    out = pl.pallas_call(
        _matmul_kernel,
        out_shape=jax.ShapeDtypeStruct((M_pad, N_pad), out_dtype),
        grid_spec=pltpu.PrefetchScalarGridSpec(
            num_scalar_prefetch=0,
            grid=grid,
            in_specs=[
                pl.BlockSpec((tm_e, tk_e), lambda i, j, k: (i, k)),  # x tile
                pl.BlockSpec((tk_e, tn_e), lambda i, j, k: (k, j)),  # W^T tile
            ],
            out_specs=pl.BlockSpec((tm_e, tn_e), lambda i, j, k: (i, j)),
            scratch_shapes=[pltpu.VMEM((tm_e, tn_e), jnp.float32)],
        ),
        compiler_params=pltpu.CompilerParams(
            dimension_semantics=("parallel", "parallel", "arbitrary"),
            vmem_limit_bytes=vmem_limit,
        ),
    )(x, wt)

    if (M_pad, N_pad) != (M, N):
        out = out[:M, :N]
    return out


def init_random_projection(key, in_features, out_features, normalize=True,
                           dtype=jnp.float32):
    """Matches RandomProjection.init_weight(); returns the weight already
    transposed to (in_features, out_features) so forward needs no per-call
    transpose (the projection is frozen, so this is a one-time cost)."""
    w = jax.random.normal(key, (out_features, in_features), dtype=jnp.float32)
    w = w / math.sqrt(in_features)
    if normalize:
        w = w / jnp.linalg.norm(w, axis=1, keepdims=True)
    return jnp.asarray(w.T, dtype=dtype)  # (in_features, out_features)


if __name__ == "__main__":
    key = jax.random.PRNGKey(0)
    k_w, k_x, k_w2, k_x2 = jax.random.split(key, 4)

    # --- Test 1: small shapes matching the module; single-block grid. ---
    batch, in_features, out_features = 16, 32, 64
    wt = init_random_projection(k_w, in_features, out_features, normalize=True)
    x = jax.random.normal(k_x, (batch, in_features), dtype=jnp.float32)

    y = jax.block_until_ready(random_projection_forward(x, wt))
    y_ref = x @ wt
    assert y.shape == (batch, out_features)
    assert jnp.allclose(y, y_ref, atol=1e-5, rtol=1e-5)

    # --- Test 2: tiled 3-D grid with padding, K accumulation and bf16 operands. ---
    M2, K2, N2 = 384, 160, 272
    wt2 = init_random_projection(k_w2, K2, N2, normalize=True, dtype=jnp.bfloat16)
    x2_f32 = jax.random.normal(k_x2, (M2, K2), dtype=jnp.float32)
    x2 = x2_f32.astype(jnp.bfloat16)

    y2 = random_projection_forward(
        x2, wt2, tm=128, tn=128, tk=128, out_dtype=jnp.float32
    )
    y2 = jax.block_until_ready(y2)
    y2_ref = x2.astype(jnp.float32) @ wt2.astype(jnp.float32)
    assert y2.shape == (M2, N2)
    assert jnp.allclose(y2, y2_ref, atol=5e-2, rtol=5e-2)

    print("KERNEL_OK")
</pallas_src>

<mosaic_0001>
module attributes {stable_mosaic.version = 11 : i64} {
  func.func @_matmul_kernel(%arg0: i32, %arg1: i32, %arg2: i32, %arg3: memref<16x32xf32, #tpu.memory_space<vmem>>, %arg4: memref<32x64xf32, #tpu.memory_space<vmem>>, %arg5: memref<16x64xf32, #tpu.memory_space<vmem>>, %arg6: memref<16x64xf32, #tpu.memory_space<vmem>>) attributes {dimension_semantics = [#tpu.dimension_semantics<parallel>, #tpu.dimension_semantics<parallel>, #tpu.dimension_semantics<arbitrary>], iteration_bounds = array<i64: 1, 1, 1>, scalar_prefetch = 0 : i64, scratch_operands = 1 : i64, tpu.core_type = #tpu.core_type<tc>, window_params = [{transform_indices = @transform_0, window_bounds = array<i64: 16, 32>}, {transform_indices = @transform_1, window_bounds = array<i64: 32, 64>}, {transform_indices = @transform_2, window_bounds = array<i64: 16, 64>}]} {
    %c0_i32 = arith.constant 0 : i32
    %0 = arith.cmpi eq, %arg2, %c0_i32 : i32
    %1 = arith.extui %0 : i1 to i32
    %c0_i32_0 = arith.constant 0 : i32
    %2 = arith.cmpi ne, %1, %c0_i32_0 : i32
    scf.if %2 {
      %cst_10 = arith.constant 0.000000e+00 : f32
      %12 = vector.broadcast %cst_10 : f32 to vector<16x64xf32>
      %c0_11 = arith.constant 0 : index
      %c0_12 = arith.constant 0 : index
      %13 = vector.load %arg6[%c0_11, %c0_12] : memref<16x64xf32, #tpu.memory_space<vmem>>, vector<16x64xf32>
      tpu.vector_store %arg6[%c0_11, %c0_12], %12 {strides = array<i32>} : memref<16x64xf32, #tpu.memory_space<vmem>>, vector<16x64xf32>,
    } else {
    }
    %c0 = arith.constant 0 : index
    %c0_1 = arith.constant 0 : index
    %3 = vector.load %arg6[%c0, %c0_1] : memref<16x64xf32, #tpu.memory_space<vmem>>, vector<16x64xf32>
    %c0_2 = arith.constant 0 : index
    %c0_3 = arith.constant 0 : index
    %4 = vector.load %arg3[%c0_2, %c0_3] : memref<16x32xf32, #tpu.memory_space<vmem>>, vector<16x32xf32>
    %c0_4 = arith.constant 0 : index
    %c0_5 = arith.constant 0 : index
    %5 = vector.load %arg4[%c0_4, %c0_5] : memref<32x64xf32, #tpu.memory_space<vmem>>, vector<32x64xf32>
    %cst = arith.constant dense<0.000000e+00> : vector<16x64xf32>
    %6 = tpu.matmul %4, %5, %cst {dimension_numbers = #tpu.dot_dimension_numbers<[1], [0], [0], [1], [0, 0, 1, 1], [], []>} : vector<16x32xf32>, vector<32x64xf32>, vector<16x64xf32> -> vector<16x64xf32>
    %7 = arith.addf %3, %6 : vector<16x64xf32>
    %c0_6 = arith.constant 0 : index
    %c0_7 = arith.constant 0 : index
    %8 = vector.load %arg6[%c0_6, %c0_7] : memref<16x64xf32, #tpu.memory_space<vmem>>, vector<16x64xf32>
    tpu.vector_store %arg6[%c0_6, %c0_7], %7 {strides = array<i32>} : memref<16x64xf32, #tpu.memory_space<vmem>>, vector<16x64xf32>,
    %c0_i32_8 = arith.constant 0 : i32
    %9 = arith.cmpi eq, %arg2, %c0_i32_8 : i32
    %10 = arith.extui %9 : i1 to i32
    %c0_i32_9 = arith.constant 0 : i32
    %11 = arith.cmpi ne, %10, %c0_i32_9 : i32
    scf.if %11 {
      %c0_10 = arith.constant 0 : index
      %c0_11 = arith.constant 0 : index
      %12 = vector.load %arg6[%c0_10, %c0_11] : memref<16x64xf32, #tpu.memory_space<vmem>>, vector<16x64xf32>
      %c0_12 = arith.constant 0 : index
      %c0_13 = arith.constant 0 : index
      %13 = vector.load %arg5[%c0_12, %c0_13] : memref<16x64xf32, #tpu.memory_space<vmem>>, vector<16x64xf32>
      tpu.vector_store %arg5[%c0_12, %c0_13], %12 {strides = array<i32>} : memref<16x64xf32, #tpu.memory_space<vmem>>, vector<16x64xf32>,
    } else {
    }
    return
  }
  func.func @transform_0(%arg0: i32, %arg1: i32, %arg2: i32) -> (i32, i32) {
    %c0_i32 = arith.constant 0 : i32
    return %arg0, %arg2 : i32, i32
  }
  func.func @transform_1(%arg0: i32, %arg1: i32, %arg2: i32) -> (i32, i32) {
    %c0_i32 = arith.constant 0 : i32
    return %arg2, %arg1 : i32, i32
  }
  func.func @transform_2(%arg0: i32, %arg1: i32, %arg2: i32) -> (i32, i32) {
    %c0_i32 = arith.constant 0 : i32
    return %arg0, %arg1 : i32, i32
  }
}

</mosaic_0001>

<bundles_post_ra>
// kernel: tpu_custom_call.1
= control target key start
LH: loop header
LB: loop body
LE: loop exit
PB: predicated region body
PF: predicated region fallthrough
CT: control target
= control target key end

     0   :  { %7 = vsyncpa [#allocation4], 0  ;;  %s344_s0 = inlined_call_operand.hbm [shape: f32[16,32], index: 0, kind: input, shape index: {}]   ;;  %s345_s1 = inlined_call_operand.hbm [shape: f32[32,64], index: 1, kind: input, shape index: {}]   ;;  %s346_s2 = inlined_call_operand.hbm [shape: f32[16,64], index: 2, kind: output, shape index: {}]  }
   0x1   :  { %8 = vsyncpa [#allocation7], 0 }
   0x2   :  { %9 = vsyncpa [#allocation5], 0  ;;  %s272_s9 = smov [#allocation3]   ;;  %s200_s13 = scalar_lea.hbm %s344_s0, 256 }
   0x3   :  { %s15_s10 = sshll.u32 %s272_s9, 4  ;;  %p201_p0 = scmp.ne.s32.totalorder %s344_s0, %s200_s13  ;;  %s16_s10 = int_to_ptr.vmem [resolvable:$true] %s15_s10 }
   0x4   :  { %p204_p1 = scmp.lt.u32.totalorder %s200_s13, %s344_s0 }
   0x6   :  { %p206_p2 = pnand %p204_p1, %p201_p0 }
   0x8   :  { %209 = shalt.err (!%p206_p2)
}
   0x9   :  { %s210_s18 = scalar_lea.vmem %s16_s10, 256  ;;  %p215_p4 = scmp.lt.s32.totalorder %s16_s10, %s16_s10 }
   0xa   :  { %p211_p3 = scmp.ne.s32.totalorder %s16_s10, %s210_s18  ;;  %p216_p5 = scmp.lt.s32.totalorder %s210_s18, %s210_s18 }
   0xc   :  { %p217_p6 = por %p216_p5, %p215_p4 }
   0xe   :  { %p218_p7 = pnand %p217_p6, %p211_p3 }
  0x10   :  { %221 = shalt.err (!%p218_p7)
}
  0x11   :  { %s273_s19 = smov 128   ;;  %s274_s20 = smov 8  }
  0x12   :  { %21 = dma.hbm_to_vmem [thread:$0]  %s344_s0, 256, %s16_s10, [#allocation4], %s273_s19, %s273_s19, %s274_s20  }
  0x13   :  { %s275_s23 = smov [#allocation6]   ;;  %s222_s27 = scalar_lea.hbm %s345_s1, 512 }
  0x14   :  { %s27_s24 = sshll.u32 %s275_s23, 4  ;;  %p223_p8 = scmp.ne.s32.totalorder %s345_s1, %s222_s27  ;;  %s28_s24 = int_to_ptr.vmem [resolvable:$true] %s27_s24 }
  0x15   :  { %p226_p9 = scmp.lt.u32.totalorder %s222_s27, %s345_s1 }
  0x17   :  { %p228_p10 = pnand %p226_p9, %p223_p8 }
  0x19   :  { %231 = shalt.err (!%p228_p10)
}
  0x1a   :  { %s232_s4 = scalar_lea.vmem %s28_s24, 512  ;;  %p237_p12 = scmp.lt.s32.totalorder %s28_s24, %s28_s24 }
  0x1b   :  { %p233_p11 = scmp.ne.s32.totalorder %s28_s24, %s232_s4  ;;  %p238_p13 = scmp.lt.s32.totalorder %s232_s4, %s232_s4 }
  0x1d   :  { %p239_p0 = por %p238_p13, %p237_p12 }
  0x1f   :  { %p240_p1 = pnand %p239_p0, %p233_p11 }
  0x21   :  { %243 = shalt.err (!%p240_p1)
}
  0x22   :  { %33 = dma.hbm_to_vmem [thread:$0]  %s345_s1, 512, %s28_s24, [#allocation7], %s273_s19, %s273_s19, %s274_s20  }
  0x23   :  { %266 = dma.done.wait [#allocation4], 256  }
  0x24   :  { %267 = vsyncadd [#allocation4], 4294967040 }
  0x25   :  { %268 = dma.done.wait [#allocation7], 512  }
  0x26   :  { %269 = vsyncadd [#allocation7], 4294966784  ;;  %vm44_vm0 = vcmask 523264   ;;  %v276_v0 = vmov 0.0   ;;  %vm55_vm1 = vcmask 261120   ;;  %v51_v1 = vld [vmem:[#allocation6] sm:$0xff] }
  0x27   :  { %46 = vst.msk [vmem:[#allocation2 + $0x8] sm:$0xff] %vm44_vm0, %v276_v0  ;;  %45 = vst.msk [vmem:[#allocation2] sm:$0xff] %vm44_vm0, %v276_v0  ;;  %v52_v2 = vld [vmem:[#allocation6 + $0x8] sm:$0xff]  ;;  %v53_v3 = vld [vmem:[#allocation6 + $0x10] sm:$0xff]  ;;  %s277_s1 = smov [#allocation8]  }
  0x28   :  { %v186_v4 = vpack.c.bf16 %v52_v2, %v51_v1  ;;  %v54_v5 = vld [vmem:[#allocation6 + $0x18] sm:$0xff]  ;;  %v49_v6 = vld [vmem:[#allocation3] sm:$0xff]  ;;  %s154_s6 = sshll.u32 %s277_s1, 4  ;;  %s155_s6 = int_to_ptr.vmem [resolvable:$true] %s154_s6 }
  0x29   :  { %v190_v7 = vpack.c.bf16 %v54_v5, %v53_v3  ;;  %183 = vmatprep.mubr.msk.f32.mxu0 %vm55_vm1, %v49_v6  ;;  %v50_v8 = vld [vmem:[#allocation3 + $0x8] sm:$0xff]  ;;  %s244_s7 = scalar_lea.vmem %s155_s6, 256  ;;  %p249_p3 = scmp.lt.s32.totalorder %s155_s6, %s155_s6 }
  0x2a   :  { %187 = vmatprep.subr.bf16.mxu0 %v186_v4  ;;  %p245_p2 = scmp.ne.s32.totalorder %s155_s6, %s244_s7  ;;  %p250_p4 = scmp.lt.s32.totalorder %s244_s7, %s244_s7 }
  0x2b   :  { %189 = vmatpush3.bf16.msra.mxu0 %v186_v4 }
  0x2c   :  { %191 = vmatprep.subr.bf16.mxu0 %v190_v7  ;;  %p251_p5 = por %p250_p4, %p249_p3 }
  0x2e   :  { %v48_v9 = vld [vmem:[#allocation2 + $0x8] sm:$0xff]  ;;  %v47_v10 = vld [vmem:[#allocation2] sm:$0xff]  ;;  %p252_p6 = pnand %p251_p5, %p245_p2 }
  0x2f   :  { %193 = vmatpush3.bf16.msra.mxu0 %v190_v7 }
  0x32   :  { %184 = vmatmul.mubr.msk.f32.vlgmr.msra.gmra.mrb[0].mxu0 %vm55_vm1, %v50_v8 }
 0x105   :  { %v185_v11 = vpop.f32.mrb[0].mxu0 }
 0x106   :  { %v138_v12 = vadd.f32 %v185_v11, %v48_v9  ;;  %v128_v13 = vpop.f32.mrb[1].mxu0 }
 0x107   :  { %v137_v14 = vadd.f32 %v128_v13, %v47_v10 }
 0x108   :  { %141 = vst.msk [vmem:[#allocation2 + $0x8] sm:$0xff] %vm44_vm0, %v138_v12 }
 0x109   :  { %140 = vst.msk [vmem:[#allocation2] sm:$0xff] %vm44_vm0, %v137_v14 }
 0x10f   :  { %v146_v15 = vld [vmem:[#allocation2 + $0x8] sm:$0xff] }
 0x110   :  { %v145_v16 = vld [vmem:[#allocation2] sm:$0xff]  ;;  %148 = vst.msk [vmem:[#allocation8 + $0x8] sm:$0xff] %vm44_vm0, %v146_v15 }
 0x111   :  { %147 = vst.msk [vmem:[#allocation8] sm:$0xff] %vm44_vm0, %v145_v16 }
 0x112   :  { %255 = shalt.err (!%p252_p6)
}
 0x113   :  { %s256_s10 = scalar_lea.hbm %s346_s2, 256 }
 0x114   :  { %p257_p7 = scmp.ne.s32.totalorder %s346_s2, %s256_s10  ;;  %p260_p8 = scmp.lt.u32.totalorder %s256_s10, %s346_s2 }
 0x116   :  { %p262_p9 = pnand %p260_p8, %p257_p7 }
 0x118   :  { %265 = shalt.err (!%p262_p9)
}
 0x119   :  { %160 = dma.vmem_to_hbm [thread:$0]  %s155_s6, 256, %s346_s2, [#allocation5], %s273_s19, %s273_s19, %s274_s20  }
 0x11a   :  { %270 = dma.done.wait [#allocation5], 256  }
 0x11b   :  { %271 = vsyncadd [#allocation5], 4294967040 }
 0x11c   :  { %164 = vsyncpa [#allocation4], 1 }
 0x11d   :  { %165 = vsyncpa [#allocation7], 1 }
 0x11e   :  { %166 = vsyncpa [#allocation5], 1 }

</bundles_post_ra>
